<compile_context>
chip_gen: v5e
topology: v5e:2x2
jax: 0.10.0
libtpu: 0.0.40
codegen_flags: <defaults>
</compile_context>

<pallas_src>
import functools

import numpy as np
import jax
import jax.numpy as jnp
from jax.experimental import pallas as pl
from jax.experimental.pallas import tpu as pltpu


def _wsinet_kernel(x_ref, tn_ref, v_ref, w_ref, fcw_ref, fcb_ref,
                   probs_ref, attn_ref, *, tb, n, d):
    # ---- load the (TB, N, D) batch tile -------------------------------------
    x3 = x_ref[...]                                    # (TB, N, D)
    x2 = x3.reshape(tb * n, d)                         # (TB*N, D): fill MXU M-dim

    # ---- attention hidden: one big MXU matmul -------------------------------
    h2 = jnp.tanh(jnp.dot(x2, v_ref[...],
                          preferred_element_type=jnp.float32))   # (TB*N, dl)
    h3 = h2.reshape(tb, n, -1)                         # (TB, N, dl)

    # ---- scores: VPU multiply + lane reduce (scale folded into W host-side) -
    scores = jnp.sum(h3 * w_ref[...][None, :, :], axis=-1)       # (TB, N)

    # ---- mask from per-row valid-patch counts (vectorized, no scalar loop) --
    col = jax.lax.broadcasted_iota(jnp.int32, (tb, n), 1)        # (TB, N)
    scores = jnp.where(col < tn_ref[...], scores, jnp.float32(-1e20))

    # ---- softmax over the patch axis (N lives in lanes -> dense EUP/VPU) ----
    m = jnp.max(scores, axis=-1, keepdims=True)        # (TB, 1)
    e = jnp.exp(scores - m)                            # (TB, N)
    attn = e / jnp.sum(e, axis=-1, keepdims=True)      # (TB, N)

    # ---- attention-weighted fusion: VPU multiply + sublane reduce -----------
    fusion = jnp.sum(attn[:, :, None] * x3, axis=1)    # (TB, D)

    # ---- classifier + softmax ------------------------------------------------
    logits = jnp.dot(fusion, fcw_ref[...],
                     preferred_element_type=jnp.float32) + fcb_ref[...]  # (TB, C)
    lm = jnp.max(logits, axis=-1, keepdims=True)
    le = jnp.exp(logits - lm)
    probs = le / jnp.sum(le, axis=-1, keepdims=True)   # (TB, C)

    probs_ref[...] = probs
    attn_ref[...] = attn


def wsinet_forward(x, true_num, V, W, fc_w, fc_b, *, tb=8):
    """x: (B, N, D) float32; true_num: (B,) int32.

    Returns (probs (B, C), attn (B, N))."""
    B, N, D = x.shape
    dl = V.shape[1]
    C = fc_w.shape[1]
    assert tb % 8 == 0, "per-step batch tile must be a sublane multiple"

    # pad batch up to a multiple of the per-step batch tile
    B_pad = ((B + tb - 1) // tb) * tb
    if B_pad != B:
        x = jnp.pad(x, ((0, B_pad - B), (0, 0), (0, 0)))
        true_num = jnp.pad(true_num, (0, B_pad - B), constant_values=N)

    # per-row valid counts as a (B_pad, 1) int32 column (VMEM tile per step)
    tn_col = true_num.astype(jnp.int32).reshape(B_pad, 1)
    # fold the 1/sqrt(dl) scale into W and lay it out as a (1, dl) lane row
    w_scaled = (W.reshape(1, dl) * (1.0 / float(np.sqrt(dl)))).astype(jnp.float32)
    fc_b2 = fc_b.reshape(1, C).astype(jnp.float32)

    grid = (B_pad // tb,)
    grid_spec = pltpu.PrefetchScalarGridSpec(
        num_scalar_prefetch=0,
        grid=grid,
        in_specs=[
            pl.BlockSpec((tb, N, D), lambda b: (b, 0, 0)),   # x batch tile
            pl.BlockSpec((tb, 1),    lambda b: (b, 0)),      # true_num column
            pl.BlockSpec((D, dl),    lambda b: (0, 0)),      # V   (grid-invariant)
            pl.BlockSpec((1, dl),    lambda b: (0, 0)),      # W / sqrt(dl)
            pl.BlockSpec((D, C),     lambda b: (0, 0)),      # fc weight
            pl.BlockSpec((1, C),     lambda b: (0, 0)),      # fc bias
        ],
        out_specs=[
            pl.BlockSpec((tb, C), lambda b: (b, 0)),         # class probs
            pl.BlockSpec((tb, N), lambda b: (b, 0)),         # soft assignments
        ],
    )

    kernel = functools.partial(_wsinet_kernel, tb=tb, n=N, d=D)

    probs, attn = pl.pallas_call(
        kernel,
        out_shape=(
            jax.ShapeDtypeStruct((B_pad, C), jnp.float32),
            jax.ShapeDtypeStruct((B_pad, N), jnp.float32),
        ),
        grid_spec=grid_spec,
        compiler_params=pltpu.CompilerParams(
            dimension_semantics=("parallel",),
            vmem_limit_bytes=64 << 20,
        ),
    )(x, tn_col, V, w_scaled, fc_w, fc_b2)

    return probs[:B], attn[:B]


def wsinet_reference(x, true_num, V, W, fc_w, fc_b):
    """Pure-JAX reference mirroring the PyTorch module (eval mode)."""
    B, N, D = x.shape
    dl = V.shape[1]
    mask = (jnp.arange(N)[None, :] < true_num[:, None])
    h = jnp.tanh(jnp.einsum('bnd,dl->bnl', x, V))
    scores = jnp.einsum('bnl,lo->bno', h, W)[..., 0] / np.sqrt(dl)
    scores = jnp.where(mask, scores, -1e20)
    attn = jax.nn.softmax(scores, axis=1)
    fusion = jnp.sum(attn[..., None] * x, axis=1)
    logits = fusion @ fc_w + fc_b
    return jax.nn.softmax(logits, axis=1), attn


if __name__ == "__main__":
    # small, module-consistent shapes (B a multiple of the batch tile -> 2 grid steps)
    B, N, D = 16, 16, 32        # batch, #patches per slide, in_channels
    dl = 64                     # MILAtten hidden dim (WsiNet uses dl=64)
    class_num = 2
    TB = 8                      # batch elements per grid step

    key = jax.random.PRNGKey(0)
    kx, kv, kw, kfw, kfb, kn = jax.random.split(key, 6)

    x = jax.random.normal(kx, (B, N, D), dtype=jnp.float32)
    # varied valid-patch counts (equivalent of true_num in get_mask)
    true_num = jax.random.randint(kn, (B,), 1, N + 1).astype(jnp.int32)

    # deterministic init matching MILAtten.reset_params / nn.Linear defaults
    std1 = 1.0 / np.sqrt(dl * D)
    std2 = 1.0 / np.sqrt(dl)
    V = jax.random.uniform(kv, (D, dl), jnp.float32, -std1, std1)
    W = jax.random.uniform(kw, (dl, 1), jnp.float32, -std2, std2)
    fc_std = 1.0 / np.sqrt(D)
    fc_w = jax.random.uniform(kfw, (D, class_num), jnp.float32, -fc_std, fc_std)
    fc_b = jax.random.uniform(kfb, (class_num,), jnp.float32, -fc_std, fc_std)

    probs, attn = wsinet_forward(x, true_num, V, W, fc_w, fc_b, tb=TB)
    jax.block_until_ready((probs, attn))

    ref_probs, ref_attn = wsinet_reference(x, true_num, V, W, fc_w, fc_b)
    np.testing.assert_allclose(np.asarray(probs), np.asarray(ref_probs),
                               rtol=1e-4, atol=1e-5)
    np.testing.assert_allclose(np.asarray(attn), np.asarray(ref_attn),
                               rtol=1e-4, atol=1e-5)

    print("KERNEL_OK")
</pallas_src>

<mosaic_0001>
module attributes {stable_mosaic.version = 11 : i64} {
  func.func @_wsinet_kernel(%arg0: i32, %arg1: memref<8x16x32xf32, #tpu.memory_space<vmem>>, %arg2: memref<8x1xi32, #tpu.memory_space<vmem>>, %arg3: memref<32x64xf32, #tpu.memory_space<vmem>>, %arg4: memref<1x64xf32, #tpu.memory_space<vmem>>, %arg5: memref<32x2xf32, #tpu.memory_space<vmem>>, %arg6: memref<1x2xf32, #tpu.memory_space<vmem>>, %arg7: memref<8x2xf32, #tpu.memory_space<vmem>>, %arg8: memref<8x16xf32, #tpu.memory_space<vmem>>) attributes {dimension_semantics = [#tpu.dimension_semantics<parallel>], iteration_bounds = array<i64: 2>, scalar_prefetch = 0 : i64, scratch_operands = 0 : i64, tpu.core_type = #tpu.core_type<tc>, window_params = [{transform_indices = @transform_0, window_bounds = array<i64: 8, 16, 32>}, {transform_indices = @transform_1, window_bounds = array<i64: 8, 1>}, {pipeline_mode = #tpu.pipeline_mode<synchronous>, transform_indices = @transform_2, window_bounds = array<i64: 32, 64>}, {pipeline_mode = #tpu.pipeline_mode<synchronous>, transform_indices = @transform_3, window_bounds = array<i64: 1, 64>}, {pipeline_mode = #tpu.pipeline_mode<synchronous>, transform_indices = @transform_4, window_bounds = array<i64: 32, 2>}, {pipeline_mode = #tpu.pipeline_mode<synchronous>, transform_indices = @transform_5, window_bounds = array<i64: 1, 2>}, {transform_indices = @transform_6, window_bounds = array<i64: 8, 2>}, {transform_indices = @transform_7, window_bounds = array<i64: 8, 16>}]} {
    %c0 = arith.constant 0 : index
    %c0_0 = arith.constant 0 : index
    %c0_1 = arith.constant 0 : index
    %0 = vector.load %arg1[%c0, %c0_0, %c0_1] : memref<8x16x32xf32, #tpu.memory_space<vmem>>, vector<8x16x32xf32>
    %1 = vector.shape_cast %0 : vector<8x16x32xf32> to vector<128x32xf32>
    %c0_2 = arith.constant 0 : index
    %c0_3 = arith.constant 0 : index
    %2 = vector.load %arg3[%c0_2, %c0_3] : memref<32x64xf32, #tpu.memory_space<vmem>>, vector<32x64xf32>
    %cst = arith.constant dense<0.000000e+00> : vector<128x64xf32>
    %3 = tpu.matmul %1, %2, %cst {dimension_numbers = #tpu.dot_dimension_numbers<[1], [0], [0], [1], [0, 0, 1, 1], [], []>} : vector<128x32xf32>, vector<32x64xf32>, vector<128x64xf32> -> vector<128x64xf32>
    %4 = math.tanh %3 : vector<128x64xf32>
    %5 = vector.shape_cast %4 : vector<128x64xf32> to vector<8x16x64xf32>
    %c0_4 = arith.constant 0 : index
    %c0_5 = arith.constant 0 : index
    %6 = vector.load %arg4[%c0_4, %c0_5] : memref<1x64xf32, #tpu.memory_space<vmem>>, vector<1x64xf32>
    %7 = vector.shape_cast %6 : vector<1x64xf32> to vector<1x1x64xf32>
    %8 = vector.broadcast %7 : vector<1x1x64xf32> to vector<8x16x64xf32>
    %9 = arith.mulf %5, %8 : vector<8x16x64xf32>
    %cst_6 = arith.constant dense<0.000000e+00> : vector<8x16xf32>
    %10 = vector.multi_reduction <add>, %9, %cst_6 [2] : vector<8x16x64xf32> to vector<8x16xf32>
    %11 = tpu.iota {dimensions = array<i32: 1>} : vector<8x16xi32>
    %c0_7 = arith.constant 0 : index
    %c0_8 = arith.constant 0 : index
    %12 = vector.load %arg2[%c0_7, %c0_8] : memref<8x1xi32, #tpu.memory_space<vmem>>, vector<8x1xi32>
    %13 = vector.broadcast %12 : vector<8x1xi32> to vector<8x16xi32>
    %14 = arith.cmpi slt, %11, %13 : vector<8x16xi32>
    %cst_9 = arith.constant -1.000000e+20 : f32
    %15 = vector.broadcast %cst_9 : f32 to vector<8x16xf32>
    %16 = arith.select %14, %10, %15 : vector<8x16xi1>, vector<8x16xf32>
    %cst_10 = arith.constant dense<0xFF800000> : vector<8xf32>
    %17 = vector.multi_reduction <maximumf>, %16, %cst_10 [1] : vector<8x16xf32> to vector<8xf32>
    %18 = vector.shape_cast %17 : vector<8xf32> to vector<8x1xf32>
    %19 = vector.broadcast %18 : vector<8x1xf32> to vector<8x16xf32>
    %20 = arith.subf %16, %19 : vector<8x16xf32>
    %21 = math.exp %20 : vector<8x16xf32>
    %cst_11 = arith.constant dense<0.000000e+00> : vector<8xf32>
    %22 = vector.multi_reduction <add>, %21, %cst_11 [1] : vector<8x16xf32> to vector<8xf32>
    %23 = vector.shape_cast %22 : vector<8xf32> to vector<8x1xf32>
    %24 = vector.broadcast %23 : vector<8x1xf32> to vector<8x16xf32>
    %25 = arith.divf %21, %24 : vector<8x16xf32>
    %26 = vector.shape_cast %25 : vector<8x16xf32> to vector<8x16x1xf32>
    %27 = vector.broadcast %26 : vector<8x16x1xf32> to vector<8x16x32xf32>
    %28 = arith.mulf %27, %0 : vector<8x16x32xf32>
    %cst_12 = arith.constant dense<0.000000e+00> : vector<8x32xf32>
    %29 = vector.multi_reduction <add>, %28, %cst_12 [1] : vector<8x16x32xf32> to vector<8x32xf32>
    %c0_13 = arith.constant 0 : index
    %c0_14 = arith.constant 0 : index
    %30 = vector.load %arg5[%c0_13, %c0_14] : memref<32x2xf32, #tpu.memory_space<vmem>>, vector<32x2xf32>
    %cst_15 = arith.constant dense<0.000000e+00> : vector<8x2xf32>
    %31 = tpu.matmul %29, %30, %cst_15 {dimension_numbers = #tpu.dot_dimension_numbers<[1], [0], [0], [1], [0, 0, 1, 1], [], []>} : vector<8x32xf32>, vector<32x2xf32>, vector<8x2xf32> -> vector<8x2xf32>
    %c0_16 = arith.constant 0 : index
    %c0_17 = arith.constant 0 : index
    %32 = vector.load %arg6[%c0_16, %c0_17] : memref<1x2xf32, #tpu.memory_space<vmem>>, vector<1x2xf32>
    %33 = vector.broadcast %32 : vector<1x2xf32> to vector<8x2xf32>
    %34 = arith.addf %31, %33 : vector<8x2xf32>
    %cst_18 = arith.constant dense<0xFF800000> : vector<8xf32>
    %35 = vector.multi_reduction <maximumf>, %34, %cst_18 [1] : vector<8x2xf32> to vector<8xf32>
    %36 = vector.shape_cast %35 : vector<8xf32> to vector<8x1xf32>
    %37 = vector.broadcast %36 : vector<8x1xf32> to vector<8x2xf32>
    %38 = arith.subf %34, %37 : vector<8x2xf32>
    %39 = math.exp %38 : vector<8x2xf32>
    %cst_19 = arith.constant dense<0.000000e+00> : vector<8xf32>
    %40 = vector.multi_reduction <add>, %39, %cst_19 [1] : vector<8x2xf32> to vector<8xf32>
    %41 = vector.shape_cast %40 : vector<8xf32> to vector<8x1xf32>
    %42 = vector.broadcast %41 : vector<8x1xf32> to vector<8x2xf32>
    %43 = arith.divf %39, %42 : vector<8x2xf32>
    %c0_20 = arith.constant 0 : index
    %c0_21 = arith.constant 0 : index
    %44 = vector.load %arg7[%c0_20, %c0_21] : memref<8x2xf32, #tpu.memory_space<vmem>>, vector<8x2xf32>
    tpu.vector_store %arg7[%c0_20, %c0_21], %43 {strides = array<i32>} : memref<8x2xf32, #tpu.memory_space<vmem>>, vector<8x2xf32>,
    %c0_22 = arith.constant 0 : index
    %c0_23 = arith.constant 0 : index
    %45 = vector.load %arg8[%c0_22, %c0_23] : memref<8x16xf32, #tpu.memory_space<vmem>>, vector<8x16xf32>
    tpu.vector_store %arg8[%c0_22, %c0_23], %25 {strides = array<i32>} : memref<8x16xf32, #tpu.memory_space<vmem>>, vector<8x16xf32>,
    return
  }
  func.func @transform_0(%arg0: i32) -> (i32, i32, i32) {
    %c0_i32 = arith.constant 0 : i32
    %c0_i32_0 = arith.constant 0 : i32
    %c0_i32_1 = arith.constant 0 : i32
    return %arg0, %c0_i32, %c0_i32_0 : i32, i32, i32
  }
  func.func @transform_1(%arg0: i32) -> (i32, i32) {
    %c0_i32 = arith.constant 0 : i32
    %c0_i32_0 = arith.constant 0 : i32
    return %arg0, %c0_i32 : i32, i32
  }
  func.func @transform_2(%arg0: i32) -> (i32, i32) {
    %c0_i32 = arith.constant 0 : i32
    %c0_i32_0 = arith.constant 0 : i32
    %c0_i32_1 = arith.constant 0 : i32
    return %c0_i32, %c0_i32_0 : i32, i32
  }
  func.func @transform_3(%arg0: i32) -> (i32, i32) {
    %c0_i32 = arith.constant 0 : i32
    %c0_i32_0 = arith.constant 0 : i32
    %c0_i32_1 = arith.constant 0 : i32
    return %c0_i32, %c0_i32_0 : i32, i32
  }
  func.func @transform_4(%arg0: i32) -> (i32, i32) {
    %c0_i32 = arith.constant 0 : i32
    %c0_i32_0 = arith.constant 0 : i32
    %c0_i32_1 = arith.constant 0 : i32
    return %c0_i32, %c0_i32_0 : i32, i32
  }
  func.func @transform_5(%arg0: i32) -> (i32, i32) {
    %c0_i32 = arith.constant 0 : i32
    %c0_i32_0 = arith.constant 0 : i32
    %c0_i32_1 = arith.constant 0 : i32
    return %c0_i32, %c0_i32_0 : i32, i32
  }
  func.func @transform_6(%arg0: i32) -> (i32, i32) {
    %c0_i32 = arith.constant 0 : i32
    %c0_i32_0 = arith.constant 0 : i32
    return %arg0, %c0_i32 : i32, i32
  }
  func.func @transform_7(%arg0: i32) -> (i32, i32) {
    %c0_i32 = arith.constant 0 : i32
    %c0_i32_0 = arith.constant 0 : i32
    return %arg0, %c0_i32 : i32, i32
  }
}

</mosaic_0001>

<bundles_post_ra>
// kernel: tpu_custom_call.1
= control target key start
LH: loop header
LB: loop body
LE: loop exit
PB: predicated region body
PF: predicated region fallthrough
CT: control target
= control target key end

     0   :  { %s1675_s0 = inlined_call_operand.hbm [shape: f32[16,16,32], index: 0, kind: input, shape index: {}]   ;;  %s1676_s1 = inlined_call_operand.vmem [shape: s32[16,1], index: 1, kind: input, shape index: {}]   ;;  %s1677_s2 = inlined_call_operand.vmem [shape: f32[32,64], index: 2, kind: input, shape index: {}]   ;;  %s1678_s3 = inlined_call_operand.vmem [shape: f32[1,64], index: 3, kind: input, shape index: {}]   ;;  %s1679_s4 = inlined_call_operand.vmem [shape: f32[32,2], index: 4, kind: input, shape index: {}]   ;;  %s1680_s5 = inlined_call_operand.vmem [shape: f32[1,2], index: 5, kind: input, shape index: {}]   ;;  %s1681_s6 = inlined_call_operand.vmem [shape: f32[16,2], index: 6, kind: output, shape index: {0}]   ;;  %s1682_s7 = inlined_call_operand.hbm [shape: f32[16,16], index: 7, kind: output, shape index: {1}]  }
   0x1   :  { %1684 = sst [smem:[#allocation9_spill]] %s1675_s0 }
   0x2   :  { %13 = vsyncpa [#allocation3], 0 }
   0x3   :  { %15 = vsyncpa [#allocation3 + $0x1], 0 }
   0x4   :  { %16 = vsyncpa [#allocation4], 0 }
   0x5   :  { %18 = vsyncpa [#allocation4 + $0x1], 0  ;;  %s1321_s24 = smov 0   ;;  %s1323_s25 = smov 0  }
   0x6   :  { %s1325_s26 = smov 0   ;;  %s1327_s27 = smov 0  }
   0x7 LB: > { %s1342_s28 = sadd.s32 4294967295, %s1276_s27   ;;  %s1031_s29 = sadd.s32 4294967294, %s1276_s27   ;;  %s1276_s27 = sphi %s1327_s27, %s1698_s27   ;;  %s1272_s26 = sphi %s1325_s26, %s1697_s26   ;;  %s1268_s25 = sphi %s1323_s25, %s1696_s25   ;;  %s1264_s24 = sphi %s1321_s24, %s1695_s24  }
   0x8   : > { %s1346_s30 = sadd.s32 1, %s1276_s27   ;;  %s31_s8 = sadd.s32 1, %s1272_s26 }
   0x9   : > { %s28_s9 = ssub.s32 %s1276_s27, %s1346_s30  ;;  %p38_p0 = scmp.ne.s32.totalorder %s1272_s26, %s1268_s25 }
   0xa   : > { %p29_p1 = scmp.eq.s32.totalorder %s28_s9, 0  ;;  %p39_p2 = scmp.eq.s32.totalorder %s1276_s27, 0 }
   0xb   : > { %p44_p3 = scmp.ne.s32.totalorder %s1268_s25, %s1264_s24  ;;  %p45_p4 = scmp.eq.s32.totalorder %s1342_s28, 0 }
   0xc   : > { %s1358_s10 = scalar_select %p29_p1, %s1272_s26, %s31_s8  }
   0xd   : > { %p1360_p5 = por %p39_p2, %p38_p0  ;;  %p1364_p6 = por %p45_p4, %p44_p3 }
   0xe   : > { %1685 = sst [smem:[#allocation8_spill]] %s1358_s10  ;;  %p204_p7 = scmp.eq.s32.totalorder %s1342_s28, 1 }
   0xf   : > { %p210_p8 = scmp.eq.s32.totalorder %s1031_s29, 1  ;;  %p1090_p10 = scmp.lt.s32.totalorder %s1276_s27, 2 }
  0x10   : > { %p1371_p11 = por %p204_p7, %p38_p0  ;;  %s242_s15 = sand.u32 1, %s1272_s26  }
  0x11   : > { %p1375_p12 = por %p210_p8, %p44_p3  ;;  %s1065_s16 = sshll.u32 %s1276_s27, 7 }
  0x12   : > { %s1034_s17 = sshll.u32 %s242_s15, 7  ;;  %s1690_s0 = sld [smem:[#allocation9_spill]] }
  0x13   : > { %s246_s22 = scalar_lea.vmem [#allocation2], %s1034_s17  ;;  %p1386_p13 = pnand %p1090_p10, %p1360_p5 }
  0x14   : > { %s255_s23 = sshll.u32 %s246_s22, 4  ;;  %p1038_p0 = scmp.ge.s32.totalorder %s1276_s27, 1  ;;  %s256_s23 = int_to_ptr.vmem [resolvable:$true] %s255_s23 }
  0x15   : > { %p270_p1 = scmp.lt.s32.totalorder %s1276_s27, 3  ;;  %s243_s8 = scalar_lea.sflag [#allocation3], %s242_s15 }
  0x16   : > { %p1184_p3 = pneg %p1386_p13 }
  0x18   : > { %s252_s20 = scalar_lea.hbm %s1690_s0, %s1065_s16  ;;  %s1187_s11 = scalar_lea.hbm %s1690_s0, 256 }
  0x19   : > { %s253_s21 = sshll.u32 %s252_s20, 4  ;;  %s254_s21 = int_to_ptr.hbm [resolvable:$true] %s253_s21 }
  0x1a   : > { %s1180_s9 = sshra.s32 %s254_s21, 4  ;;  %s1181_s9 = int_to_ptr.hbm [resolvable:$true] %s1180_s9 }
  0x1b   : > { %s1182_s10 = scalar_lea.hbm %s1181_s9, 128  ;;  %p1188_p5 = scmp.lt.s32.totalorder %s1181_s9, %s1690_s0 }
  0x1c   : > { %p1183_p2 = scmp.ne.s32.totalorder %s1181_s9, %s1182_s10  ;;  %p1189_p8 = scmp.lt.s32.totalorder %s1187_s11, %s1182_s10 }
  0x1e   : > { %p1185_p4 = pnand %p1184_p3, %p1183_p2  ;;  %p1190_p10 = por %p1189_p8, %p1188_p5 }
  0x20   : > { %p1186_p7 = pneg %p1185_p4 }
  0x22   : > { %p1191_p9 = pnand %p1190_p10, %p1186_p7 }
  0x24   : > { %1194 = shalt.err (!%p1191_p9)
}
  0x25   : > { %s1278_s15 = smov 128   ;;  %s1279_s20 = smov 8  }
  0x26   : > { %1085 = dma.hbm_to_vmem [thread:$0]  (!%p1386_p13), %s254_s21, 2048, %s256_s23, %s243_s8, %s1278_s15, %s1278_s15, %s1279_s20  }
  0x27   : > { %p271_p2 = pnand %p1038_p0, %p270_p1 }
  0x28   : > { %s1407_s22 = sand.u32 (!%p271_p2), 1, %s1268_s25  }
  0x29   : > { %274 = sbr.rel (%p271_p2) target bundleno = 1227 (0x4cb), region = 44  ;;  %s1039_s10 = sshll.u32 (!%p271_p2), %s1407_s22, 7 }
  0x2a   : > { %s277_s9 = scalar_lea.sflag (!%p271_p2), [#allocation3], %s1407_s22  ;;  %s1411_s16 = scalar_lea.vmem (!%p271_p2), [#allocation2], %s1039_s10 }
  0x2e   : > { %1255 = dma.done.wait (%p1364_p6), %s277_s9, 2048  }
  0x2f   : > { %1257 = vsyncadd (%p1364_p6), %s277_s9, 4294965248  ;;  %v348_v0 = vld [vmem:[%s1677_s2 + $0x18] sm:$0xff]  ;;  %v347_v1 = vld [vmem:[%s1677_s2 + $0x10] sm:$0xff]  ;;  %vm349_vm0 = vcmask 261120   ;;  %vm499_vm1 = vcmask 523264   ;;  %v1280_v55 = vmov 0  }
  0x30   : > { %410 = vmatpush.msra.mxu0 %v348_v0  ;;  %1067 = vmatpush.msra.mxu2 %v348_v0  ;;  %v346_v2 = vld [vmem:[%s1677_s2 + $0x8] sm:$0xff]  ;;  %v345_v3 = vld [vmem:[%s1677_s2] sm:$0xff]  ;;  %v1433_v5 = vld [vmem:[%s1411_s16 + $0x30] sm:$0xff]  ;;  %p321_p6 = scmp.lt.s32.totalorder %s1342_s28, 1  ;;  %vm574_vm2 = vcmask 130112   ;;  %vm597_vm3 = vcmask 1041409  }
  0x31   : > { %1066 = vmatpush.msra.mxu1 %v348_v0  ;;  %1068 = vmatpush.msra.mxu3 %v348_v0  ;;  %v1430_v4 = vld [vmem:[%s1411_s16] sm:$0xff]  ;;  %v1439_v7 = vld [vmem:[%s1411_s16 + $0x58] sm:$0xff]  ;;  %v1453_v9 = vld [vmem:[%s1411_s16 + $0x8] sm:$0xff]  ;;  %vm599_vm4 = vcmask 1042434   ;;  %vm601_vm5 = vcmask 1043459   ;;  %vm603_vm6 = vcmask 1044484  }
  0x32   : > { %411 = vmatpush.msra.mxu0 %v347_v1  ;;  %1070 = vmatpush.msra.mxu2 %v347_v1  ;;  %v1436_v6 = vld [vmem:[%s1411_s16 + $0x20] sm:$0xff]  ;;  %v1450_v8 = vld [vmem:[%s1411_s16 + $0x38] sm:$0xff]  ;;  %v1459_v11 = vld [vmem:[%s1411_s16 + $0x28] sm:$0xff]  ;;  %s1548_s20 = scalar_select %p321_p6, %s1342_s28, 1  ;;  %vm605_vm7 = vcmask 1045509   ;;  %vm607_vm8 = vcmask 1046534  }
  0x33   : > { %1069 = vmatpush.msra.mxu1 %v347_v1  ;;  %1071 = vmatpush.msra.mxu3 %v347_v1  ;;  %v1456_v10 = vld [vmem:[%s1411_s16 + $0x60] sm:$0xff]  ;;  %v1473_v13 = vld [vmem:[%s1411_s16 + $0x10] sm:$0xff]  ;;  %v1476_v14 = vld [vmem:[%s1411_s16 + $0x68] sm:$0xff]  ;;  %vm609_vm9 = vcmask 1047559   ;;  %vm613_vm10 = vcmask 130048   ;;  %s1040_s23 = sshll.u32 %s1407_s22, 3 }
  0x34   : > { %412 = vmatpush.msra.mxu0 %v346_v2  ;;  %1073 = vmatpush.msra.mxu2 %v346_v2  ;;  %v1470_v12 = vld [vmem:[%s1411_s16 + $0x40] sm:$0xff]  ;;  %v1485_v15 = vld [vmem:[%s1411_s16 + $0x48] sm:$0xff]  ;;  %v1488_v16 = vld [vmem:[%s1411_s16 + $0x18] sm:$0xff]  ;;  %s1683_s10 = sshll.u32 %s1548_s20, 3  ;;  %s1574_s29 = scalar_lea.vmem [#allocation5], %s1040_s23 }
  0x35   : > { %1072 = vmatpush.msra.mxu1 %v346_v2  ;;  %1074 = vmatpush.msra.mxu3 %v346_v2  ;;  %v1491_v17 = vld [vmem:[%s1411_s16 + $0x70] sm:$0xff]  ;;  %v1503_v19 = vld [vmem:[%s1411_s16 + $0x78] sm:$0xff]  ;;  %v1512_v22 = vld [vmem:[%s1678_s3] ss:$0 sm:$0xff]  ;;  %s324_s21 = scalar_lea.vmem %s1676_s1, %s1683_s10  ;;  %s1061_s23 = sshll.u32 %s1342_s28, 3 }
  0x36   : > { %413 = vmatpush.msra.mxu0 %v345_v3  ;;  %1076 = vmatpush.msra.mxu2 %v345_v3  ;;  %v1500_v18 = vld [vmem:[%s1411_s16 + $0x50] sm:$0xff]  ;;  %s920_s11 = scalar_lea.hbm %s1682_s7, %s1061_s23  ;;  %s922_s12 = sshll.u32 %s1574_s29, 4  ;;  %s923_s12 = int_to_ptr.vmem [resolvable:$true] %s922_s12 }
  0x37   : > { %1043 = vmatmul.msk.f32.vlgmr.msra.gmra.mxu0 %vm349_vm0, %v1430_v4  ;;  %1049 = vmatmul.msk.f32.vlgmr.msra.gmra.mxu2 %vm349_vm0, %v1433_v5  ;;  %s924_s18 = sshll.u32 %s920_s11, 4  ;;  %s907_s19 = scalar_lea.sflag [#allocation4], %s1407_s22  ;;  %s925_s18 = int_to_ptr.hbm [resolvable:$true] %s924_s18 }
  0x38   : > { %1075 = vmatpush.msra.mxu1 %v345_v3  ;;  %1077 = vmatpush.msra.mxu3 %v345_v3  ;;  %s1224_s15 = sshra.s32 %s925_s18, 4  ;;  %s1230_s28 = scalar_lea.hbm %s1682_s7, 16  ;;  %s1225_s15 = int_to_ptr.hbm [resolvable:$true] %s1224_s15 }
  0x39   : > { %1047 = vmatmul.msk.f32.vlgmr.msra.gmra.mxu1 %vm349_vm0, %v1436_v6  ;;  %1054 = vmatmul.msk.f32.vlgmr.msra.gmra.mxu3 %vm349_vm0, %v1439_v7  ;;  %s1226_s9 = scalar_lea.hbm %s1225_s15, 8  ;;  %p1231_p1 = scmp.lt.s32.totalorder %s1225_s15, %s1682_s7 }
  0x3a   : > { %1127 = vset.pattern.permute.xlu1 %v1280_v55  ;;  %p1227_p9 = scmp.ne.s32.totalorder %s1225_s15, %s1226_s9  ;;  %p1232_p3 = scmp.lt.s32.totalorder %s1230_s28, %s1226_s9 }
  0x3c   : > { %p1228_p13 = pnand %p1227_p9, %p1371_p11  ;;  %p1233_p4 = por %p1232_p3, %p1231_p1 }
  0x3e   : > { %p1229_p0 = pneg %p1228_p13 }
  0x3f   : > { %1050 = vmatmul.msk.f32.gmra.mxu2 %vm349_vm0, %v1450_v8  ;;  %1044 = vmatmul.msk.f32.gmra.mxu0 %vm349_vm0, %v1453_v9 }
  0x40   : > { %p1234_p7 = pnand %p1233_p4, %p1229_p0 }
  0x41   : > { %1055 = vmatmul.msk.f32.gmra.mxu3 %vm349_vm0, %v1456_v10  ;;  %1048 = vmatmul.msk.f32.gmra.mxu1 %vm349_vm0, %v1459_v11 }
  0x47   : > { %1051 = vmatmul.msk.f32.gmra.mxu2 %vm349_vm0, %v1470_v12  ;;  %1045 = vmatmul.msk.f32.gmra.mxu0 %vm349_vm0, %v1473_v13 }
  0x49   : > { %1056 = vmatmul.msk.f32.gmra.mxu3 %vm349_vm0, %v1476_v14 }
  0x4f   : > { %1052 = vmatmul.msk.f32.gmra.mxu2 %vm349_vm0, %v1485_v15  ;;  %1046 = vmatmul.msk.f32.gmra.mxu0 %vm349_vm0, %v1488_v16 }
  0x51   : > { %1057 = vmatmul.msk.f32.gmra.mxu3 %vm349_vm0, %v1491_v17 }
  0x57   : > { %1053 = vmatmul.msk.f32.gmra.mxu2 %vm349_vm0, %v1500_v18 }
  0x59   : > { %1058 = vmatmul.msk.f32.gmra.mxu3 %vm349_vm0, %v1503_v19 }
  0xb4   : > { %v415_v20 = vpop.f32.mrf.mxu0 }
  0xb5   : > { %1140 = vtanh.f32 %v415_v20 }
  0xb6   : > { %v427_v21 = vpop.f32.mrf.mxu1 }
  0xb7   : > { %1142 = vtanh.f32 %v427_v21 }
  0xba   : > { %v433_v23 = vpop.f32.mrf.mxu2 }
  0xbb   : > { %v1141_v24 = vpop.eup %1140  ;;  %1144 = vtanh.f32 %v433_v23 }
  0xbc   : > { %v483_v25 = vmul.f32 %v1141_v24, %v1512_v22  ;;  %v418_v26 = vpop.f32.mrf.mxu0  ;;  %v448_v27 = vpop.f32.mrf.mxu3 }
  0xbd   : > { %v1143_v28 = vpop.eup %1142  ;;  %1146 = vtanh.f32 %v448_v27 }
  0xbe   : > { %v500_v29 = vsel %vm499_vm1, %v483_v25, 0.0  ;;  %v487_v30 = vmul.f32 %v1143_v28, %v1512_v22  ;;  %v430_v31 = vpop.f32.mrf.mxu1  ;;  %1148 = vtanh.f32 %v418_v26 }
  0xbf   : > { %501 = vadd.xlane.f32.xlu0 %v500_v29  ;;  %1150 = vtanh.f32 %v430_v31 }
  0xc0   : > { %v512_v32 = vsel %vm499_vm1, %v487_v30, 0.0 }
  0xc1   : > { %v1145_v33 = vpop.eup %1144  ;;  %513 = vadd.xlane.f32.xlu2 %v512_v32 }
  0xc2   : > { %v436_v34 = vpop.f32.mrf.mxu2  ;;  %v489_v35 = vmul.f32 %v1145_v33, %v1512_v22 }
  0xc3   : > { %1152 = vtanh.f32 %v436_v34  ;;  %v1147_v36 = vpop.eup %1146 }
  0xc4   : > { %v421_v37 = vpop.f32.mrf.mxu0  ;;  %v451_v38 = vpop.f32.mrf.mxu3  ;;  %v494_v39 = vmul.f32 %v1147_v36, %v1512_v22  ;;  %v518_v41 = vsel %vm499_vm1, %v489_v35, 0.0 }
  0xc5   : > { %1154 = vtanh.f32 %v421_v37  ;;  %v1149_v40 = vpop.eup %1148 }
  0xc6   : > { %v1151_v42 = vpop.eup %1150  ;;  %v533_v43 = vsel %vm499_vm1, %v494_v39, 0.0  ;;  %1156 = vtanh.f32 %v451_v38  ;;  %v484_v47 = vmul.f32 %v1149_v40, %v1512_v22  ;;  %v550_v39 = vld [vmem:[%s324_s21] sm:$0xff] }
  0xc7   : > { %519 = vadd.xlane.f32.xlu0 %v518_v41  ;;  %v488_v48 = vmul.f32 %v1151_v42, %v1512_v22 }
  0xc8   : > { %v503_v52 = vsel %vm499_vm1, %v484_v47, 0.0  ;;  %v548_v47 = vlaneseq }
  0xc9   : > { %v1153_v44 = vpop.eup %1152  ;;  %534 = vadd.xlane.f32.xlu2 %v533_v43  ;;  %v515_v53 = vsel %vm499_vm1, %v488_v48, 0.0 }
  0xca   : > { %v439_v45 = vpop.f32.mrf.mxu2  ;;  %v490_v46 = vmul.f32 %v1153_v44, %v1512_v22 }
  0xcb   : > { %v1155_v49 = vpop.eup %1154  ;;  %1158 = vtanh.f32 %v439_v45 }
  0xcc   : > { %v521_v50 = vsel %vm499_vm1, %v490_v46, 0.0  ;;  %v454_v51 = vpop.f32.mrf.mxu3  ;;  %v485_v54 = vmul.f32 %v1155_v49, %v1512_v22  ;;  %v1157_v56 = vpop.eup %1156 }
  0xcd   : > { %522 = vadd.xlane.f32.xlu1 %v521_v50  ;;  %1160 = vtanh.f32 %v454_v51  ;;  %v424_v58 = vpop.f32.mrf.mxu0  ;;  %v495_v61 = vmul.f32 %v1157_v56, %v1512_v22  ;;  %v549_v50 = vand.u32 127, %v548_v47 }
  0xce   : > { %v506_v60 = vsel %vm499_vm1, %v485_v54, 0.0 }
  0xcf   : > { %504 = vadd.xlane.f32.xlu0 %v503_v52  ;;  %v536_v1 = vsel %vm499_vm1, %v495_v61, 0.0  ;;  %v572_v52 = vadd.s32 4294967288, %v549_v50 }
  0xd1   : > { %v1159_v57 = vpop.eup %1158  ;;  %516 = vadd.xlane.f32.xlu2 %v515_v53 }
  0xd2   : > { %v442_v59 = vpop.f32.mrf.mxu2  ;;  %v491_v62 = vmul.f32 %v1159_v57, %v1512_v22 }
  0xd3   : > { %v1161_v63 = vpop.eup %1160  ;;  %1162 = vtanh.f32 %v442_v59 }
  0xd4   : > { %1164 = vtanh.f32 %v424_v58  ;;  %v457_v0 = vpop.f32.mrf.mxu3  ;;  %v524_v2 = vsel %vm499_vm1, %v491_v62, 0.0  ;;  %v496_v3 = vmul.f32 %v1161_v63, %v1512_v22 }
  0xd5   : > { %507 = vadd.xlane.f32.xlu1 %v506_v60  ;;  %1166 = vtanh.f32 %v457_v0 }
  0xd6   : > { %v539_v23 = vsel %vm499_vm1, %v496_v3, 0.0 }
  0xd7   : > { %537 = vadd.xlane.f32.xlu0 %v536_v1 }
  0xd9   : > { %v1163_v20 = vpop.eup %1162  ;;  %525 = vadd.xlane.f32.xlu2 %v524_v2 }
  0xda   : > { %v1165_v21 = vpop.eup %1164  ;;  %v492_v24 = vmul.f32 %v1163_v20, %v1512_v22  ;;  %v445_v25 = vpop.f32.mrf.mxu2 }
  0xdb   : > { %v1167_v26 = vpop.eup %1166  ;;  %1168 = vtanh.f32 %v445_v25  ;;  %v486_v30 = vmul.f32 %v1165_v21, %v1512_v22 }
  0xdc   : > { %v527_v27 = vsel %vm499_vm1, %v492_v24, 0.0  ;;  %v460_v28 = vpop.f32.mrf.mxu3  ;;  %v497_v29 = vmul.f32 %v1167_v26, %v1512_v22 }
  0xdd   : > { %540 = vadd.xlane.f32.xlu1 %v539_v23  ;;  %1170 = vtanh.f32 %v460_v28  ;;  %v509_v33 = vsel %vm499_vm1, %v486_v30, 0.0 }
  0xde   : > { %v542_v31 = vsel %vm499_vm1, %v497_v29, 0.0 }
  0xdf   : > { %528 = vadd.xlane.f32.xlu0 %v527_v27 }
  0xe1   : > { %543 = vadd.xlane.f32.xlu2 %v542_v31  ;;  %v1169_v32 = vpop.eup %1168 }
  0xe2   : > { %v493_v36 = vmul.f32 %v1169_v32, %v1512_v22 }
  0xe3   : > { %v1171_v34 = vpop.eup %1170 }
  0xe4   : > { %v498_v35 = vmul.f32 %v1171_v34, %v1512_v22  ;;  %v530_v38 = vsel %vm499_vm1, %v493_v36, 0.0 }
  0xe5   : > { %510 = vadd.xlane.f32.xlu1 %v509_v33 }
  0xe6   : > { %v545_v37 = vsel %vm499_vm1, %v498_v35, 0.0  ;;  %vm875_vm1 = vcmask 15360  }
  0xe7   : > { %546 = vadd.xlane.f32.xlu0 %v545_v37 }
  0xed   : > { %531 = vadd.xlane.f32.xlu1 %v530_v38 }
 0x106   : > { %552 = vperm.xlu1 %1127, %v550_v39  }
 0x132   : > { %v502_v22 = vpop.xlane.xlu0 %501 }
 0x133   : > { %v571_v56 = vperm.slane %v502_v22, %v549_v50 }
 0x134   : > { %v514_v41 = vpop.xlane.xlu2 %513 }
 0x135   : > { %v579_v58 = vperm.slane %v514_v41, %v549_v50 }
 0x13a   : > { %v520_v42 = vpop.xlane.xlu0 %519 }
 0x13b   : > { %v582_v3 = vperm.slane %v520_v42, %v549_v50 }
 0x13c   : > { %v535_v44 = vpop.xlane.xlu2 %534 }
 0x13d   : > { %v589_v25 = vperm.slane %v535_v44, %v572_v52 }
 0x140   : > { %v523_v40 = vpop.xlane.xlu1 %522 }
 0x141   : > { %v583_v1 = vperm.slane %v523_v40, %v572_v52 }
 0x142   : > { %v505_v45 = vpop.xlane.xlu0 %504 }
 0x143   : > { %v573_v54 = vperm.slane %v505_v45, %v572_v52  ;;  %v584_v24 = vsel %vm574_vm2, %v583_v1, %v582_v3 }
 0x144   : > { %v517_v48 = vpop.xlane.xlu2 %516 }
 0x145   : > { %v580_v59 = vperm.slane %v517_v48, %v572_v52  ;;  %v575_v62 = vsel %vm574_vm2, %v573_v54, %v571_v56 }
 0x147   : > { %v581_v2 = vsel %vm574_vm2, %v580_v59, %v579_v58 }
 0x148   : > { %v508_v43 = vpop.xlane.xlu1 %507 }
 0x149   : > { %v576_v55 = vperm.slane %v508_v43, %v549_v50 }
 0x14a   : > { %v538_v49 = vpop.xlane.xlu0 %537 }
 0x14b   : > { %v591_v36 = vperm.slane %v538_v49, %v549_v50 }
 0x14c   : > { %v526_v60 = vpop.xlane.xlu2 %525 }
 0x14d   : > { %v585_v26 = vperm.slane %v526_v60, %v549_v50 }
 0x150   : > { %v541_v46 = vpop.xlane.xlu1 %540 }
 0x151   : > { %v592_v31 = vperm.slane %v541_v46, %v572_v52 }
 0x152   : > { %v529_v61 = vpop.xlane.xlu0 %528 }
 0x153   : > { %v586_v23 = vperm.slane %v529_v61, %v572_v52  ;;  %v593_v38 = vsel %vm574_vm2, %v592_v31, %v591_v36 }
 0x154   : > { %v544_v27 = vpop.xlane.xlu2 %543 }
 0x155   : > { %v587_v32 = vsel %vm574_vm2, %v586_v23, %v585_v26  ;;  %v594_v33 = vperm.slane %v544_v27, %v549_v50 }
 0x158   : > { %v511_v51 = vpop.xlane.xlu1 %510 }
 0x159   : > { %v577_v53 = vperm.slane %v511_v51, %v572_v52  ;;  %v640_v51 = vshrl.u32 %v548_v47, 7 }
 0x15a   : > { %v547_v28 = vpop.xlane.xlu0 %546 }
 0x15b   : > { %v578_v57 = vsel %vm574_vm2, %v577_v53, %v576_v55  ;;  %v595_v34 = vperm.slane %v547_v28, %v572_v52  ;;  %1128 = vset.pattern.permute.xlu2 %v640_v51  ;;  %v647_v52 = vadd.s32 8, %v640_v51  ;;  %1130 = vset.pattern.permute.xlu1 %v640_v51 }
 0x15c   : > { %v598_v63 = vsel %vm597_vm3, %v578_v57, %v575_v62 }
 0x15d   : > { %v600_v20 = vsel %vm599_vm4, %v581_v2, %v598_v63  ;;  %v596_v39 = vsel %vm574_vm2, %v595_v34, %v594_v33  ;;  %1129 = vset.pattern.permute.xlu0 %v647_v52 }
 0x15e   : > { %v602_v29 = vsel %vm601_vm5, %v584_v24, %v600_v20 }
 0x15f   : > { %v604_v35 = vsel %vm603_vm6, %v587_v32, %v602_v29 }
 0x160   : > { %v532_v0 = vpop.xlane.xlu1 %531 }
 0x161   : > { %v588_v21 = vperm.slane %v532_v0, %v549_v50 }
 0x163   : > { %v590_v30 = vsel %vm574_vm2, %v589_v25, %v588_v21 }
 0x164   : > { %v606_v37 = vsel %vm605_vm7, %v590_v30, %v604_v35 }
 0x165   : > { %v608_v22 = vsel %vm607_vm8, %v593_v38, %v606_v37 }
 0x166   : > { %v610_v41 = vsel %vm609_vm9, %v596_v39, %v608_v22 }
 0x178   : > { %v553_v40 = vpop.permute.xlu1 %552 }
 0x179   : > { %vm554_vm11 = vcmp.lt.s32.totalorder %v549_v50, %v553_v40 }
 0x17a   : > { %v612_v42 = vsel %vm554_vm11, %v610_v41, -1e+20 }
 0x17b   : > { %v614_v43 = vsel %vm613_vm10, %v612_v42, -inf }
 0x17c   : > { %615 = vmax.xlane.f32.xlu2 %v614_v43 }
 0x1ef   : > { %v616_v44 = vpop.xlane.xlu2 %615 }
 0x1f0   : > { %v617_v45 = vsub.f32 %v612_v42, %v616_v44 }
 0x1f2   : > { %v618_v46 = vmul.f32 1.442695, %v617_v45 }
 0x1f4   : > { %1172 = vpow2.f32 %v618_v46 }
 0x1fa   : > { %v1173_v48 = vpop.eup %1172 }
 0x1fb   : > { %v620_v49 = vsel %vm613_vm10, %v1173_v48, 0.0 }
 0x1fc   : > { %621 = vadd.xlane.f32.xlu0 %v620_v49 }
 0x26f   : > { %v622_v50 = vpop.xlane.xlu0 %621 }
 0x270   : > { %1174 = vrcp.f32 %v622_v50  ;;  %v634_v56 = vand.u32 2147483648, %v622_v50  ;;  %v632_v58 = vand.u32 2147483647, %v622_v50  ;;  %vm628_vm13 = vweird.f32 %v622_v50 }
 0x272   : > { %v635_v60 = vor.u32 1.1754944e-38, %v634_v56  ;;  %vm633_vm15 = vcmp.eq.f32.partialorder %v632_v58, 8.507059e+37  ;;  %v830_v56 = vld [vmem:[%s1679_s4] sm:$0xff] }
 0x276   : > { %v1175_v53 = vpop.eup %1174 }
 0x277   : > { %v624_v54 = vmul.f32 %v1175_v53, %v622_v50  ;;  %vm629_vm12 = vweird.f32 %v1175_v53 }
 0x278   : > { %vm630_vm14 = vmor %vm628_vm13, %vm629_vm12 }
 0x279   : > { %v625_v55 = vsub.f32 1.0, %v624_v54 }
 0x27b   : > { %v626_v57 = vmul.f32 %v1175_v53, %v625_v55 }
 0x27d   : > { %v627_v59 = vadd.f32 %v1175_v53, %v626_v57 }
 0x27f   : > { %v631_v47 = vsel %vm630_vm14, %v1175_v53, %v627_v59 }
 0x280   : > { %v636_v61 = vsel %vm633_vm15, %v635_v60, %v631_v47 }
 0x281   : > { %v637_v62 = vmul.f32 %v1173_v48, %v636_v61  ;;  %v831_v48 = vld [vmem:[%s1679_s4 + $0x8] sm:$0xff] }
 0x283   : > { %v651_v63 = vperm.slane %v637_v62, 1  ;;  %v638_v0 = vperm.slane %v637_v62, 0  ;;  %901 = vst.msk [vmem:[%s1574_s29] sm:$0xff] %vm613_vm10, %v637_v62  ;;  %v664_v1 = vperm.slane %v637_v62, 2  ;;  %v690_v2 = vperm.slane %v637_v62, 4 }
 0x284   : > { %v677_v3 = vperm.slane %v637_v62, 3  ;;  %v716_v20 = vperm.slane %v637_v62, 6  ;;  %v703_v21 = vperm.slane %v637_v62, 5  ;;  %v729_v23 = vperm.slane %v637_v62, 7 }
 0x285   : > { %656 = vperm.xlu1 %1130, %v651_v63   ;;  %649 = vperm.xlu0 %1129, %v638_v0  }
 0x286   : > { %643 = vperm.xlu2 %1128, %v638_v0  }
 0x28d   : > { %669 = vperm.xlu1 %1130, %v664_v1   ;;  %701 = vperm.xlu0 %1129, %v690_v2  }
 0x28e   : > { %1131 = vset.pattern.permute.xlu2 %v647_v52 }
 0x295   : > { %682 = vperm.xlu1 %1130, %v677_v3   ;;  %1134 = vset.pattern.permute.xlu0 %v640_v51 }
 0x296   : > { %662 = vperm.xlu2 %1131, %v651_v63  }
 0x29d   : > { %695 = vperm.xlu1 %1130, %v690_v2   ;;  %721 = vperm.xlu0 %1134, %v716_v20  }
 0x29e   : > { %675 = vperm.xlu2 %1131, %v664_v1  }
 0x2a5   : > { %1133 = vset.pattern.permute.xlu1 %v647_v52  ;;  %1137 = vset.pattern.permute.xlu0 %v647_v52 }
 0x2a6   : > { %688 = vperm.xlu2 %1131, %v677_v3  }
 0x2ad   : > { %714 = vperm.xlu1 %1133, %v703_v21  }
 0x2ae   : > { %1132 = vset.pattern.permute.xlu2 %v640_v51 }
 0x2b5   : > { %1136 = vset.pattern.permute.xlu1 %v640_v51 }
 0x2b6   : > { %708 = vperm.xlu2 %1132, %v703_v21  }
 0x2bd   : > { %734 = vperm.xlu1 %1136, %v729_v23  }
 0x2be   : > { %1135 = vset.pattern.permute.xlu2 %v647_v52 }
 0x2c6   : > { %727 = vperm.xlu2 %1135, %v716_v20  }
 0x2ce   : > { %740 = vperm.xlu2 %1135, %v729_v23  }
 0x2e0   : > { %v644_v24 = vpop.permute.xlu2 %643 }
 0x2e1   : > { %v742_v37 = vmul.f32 %v644_v24, %v1430_v4  ;;  %v833_v4 = vld [vmem:[%s1679_s4 + $0x18] sm:$0xff] }
 0x2e2   : > { %867 = vmatpush.msrb.mxu1 %v833_v4 }
 0x2f0   : > { %v663_v26 = vpop.permute.xlu2 %662 }
 0x2f1   : > { %v745_v38 = vmul.f32 %v663_v26, %v1488_v16 }
 0x2f7   : > { %v657_v25 = vpop.permute.xlu1 %656  ;;  %v650_v29 = vpop.permute.xlu0 %649 }
 0x2f8   : > { %v676_v28 = vpop.permute.xlu2 %675  ;;  %v744_v33 = vmul.f32 %v657_v25, %v1473_v13  ;;  %v743_v34 = vmul.f32 %v650_v29, %v1453_v9 }
 0x2f9   : > { %v747_v40 = vmul.f32 %v676_v28, %v1459_v11  ;;  %v768_v11 = vsel %vm349_vm0, %v745_v38, 0.0 }
 0x2fa   : > { %v767_v42 = vsel %vm349_vm0, %v744_v33, 0.0  ;;  %v759_v13 = vsel %vm349_vm0, %v743_v34, 0.0 }
 0x2fb   : > { %v769_v44 = vadd.f32 %v768_v11, %v767_v42 }
 0x2fd   : > { %v770_v60 = vrot.slane %v769_v44, 4 }
 0x2ff   : > { %v670_v27 = vpop.permute.xlu1 %669  ;;  %v702_v32 = vpop.permute.xlu0 %701  ;;  %v771_v20 = vadd.f32 %v770_v60, %v769_v44 }
 0x300   : > { %v689_v31 = vpop.permute.xlu2 %688  ;;  %v746_v36 = vmul.f32 %v670_v27, %v1436_v6  ;;  %v751_v6 = vmul.f32 %v702_v32, %v1485_v15  ;;  %v832_v15 = vld [vmem:[%s1679_s4 + $0x10] sm:$0xff] }
 0x301   : > { %v749_v9 = vmul.f32 %v689_v31, %v1450_v8  ;;  %v777_v8 = vsel %vm349_vm0, %v747_v40, 0.0  ;;  %868 = vmatpush.msrb.mxu1 %v832_v15  ;;  %v772_v27 = vrot.slane %v771_v20, 2 }
 0x302   : > { %v776_v43 = vsel %vm349_vm0, %v746_v36, 0.0  ;;  %v795_v50 = vsel %vm349_vm0, %v751_v6, 0.0 }
 0x303   : > { %v778_v49 = vadd.f32 %v777_v8, %v776_v43  ;;  %v786_v51 = vsel %vm349_vm0, %v749_v9, 0.0  ;;  %869 = vmatpush.msrb.mxu1 %v831_v48 }
 0x305   : > { %v779_v61 = vrot.slane %v778_v49, 4  ;;  %870 = vmatpush.msrb.mxu1 %v830_v56 }
 0x307   : > { %v683_v30 = vpop.permute.xlu1 %682  ;;  %v780_v24 = vadd.f32 %v779_v61, %v778_v49 }
 0x308   : > { %v748_v39 = vmul.f32 %v683_v30, %v1433_v5  ;;  %v758_v5 = vsel %vm349_vm0, %v742_v37, 0.0 }
 0x309   : > { %v760_v45 = vadd.f32 %v759_v13, %v758_v5  ;;  %v781_v30 = vrot.slane %v780_v24, 2 }
 0x30b   : > { %v761_v47 = vrot.slane %v760_v45, 4  ;;  %v782_v38 = vadd.f32 %v781_v30, %v780_v24 }
 0x30d   : > { %v762_v21 = vadd.f32 %v761_v47, %v760_v45  ;;  %v783_v4 = vrot.slane %v782_v38, 1 }
 0x30f   : > { %v696_v35 = vpop.permute.xlu1 %695  ;;  %v722_v16 = vpop.permute.xlu0 %721  ;;  %v763_v28 = vrot.slane %v762_v21, 2  ;;  %v784_v48 = vadd.f32 %v783_v4, %v782_v38 }
 0x310   : > { %v709_v22 = vpop.permute.xlu2 %708  ;;  %v750_v41 = vmul.f32 %v696_v35, %v1470_v12  ;;  %v785_v12 = vsel %vm349_vm0, %v748_v39, 0.0  ;;  %v754_v54 = vmul.f32 %v722_v16, %v1456_v10  ;;  %v773_v35 = vadd.f32 %v772_v27, %v771_v20 }
 0x311   : > { %v752_v52 = vmul.f32 %v709_v22, %v1500_v18  ;;  %v787_v53 = vadd.f32 %v786_v51, %v785_v12  ;;  %v764_v36 = vadd.f32 %v763_v28, %v762_v21 }
 0x312   : > { %v794_v46 = vsel %vm349_vm0, %v750_v41, 0.0  ;;  %v812_v0 = vsel %vm349_vm0, %v754_v54, 0.0  ;;  %v774_v9 = vrot.slane %v773_v35, 1 }
 0x313   : > { %v796_v57 = vadd.f32 %v795_v50, %v794_v46  ;;  %v803_v62 = vsel %vm349_vm0, %v752_v52, 0.0  ;;  %v788_v10 = vrot.slane %v787_v53, 4  ;;  %v765_v43 = vrot.slane %v764_v36, 1 }
 0x314   : > { %v775_v8 = vadd.f32 %v774_v9, %v773_v35 }
 0x315   : > { %v797_v3 = vrot.slane %v796_v57, 4  ;;  %v789_v25 = vadd.f32 %v788_v10, %v787_v53 }
 0x317   : > { %v790_v31 = vrot.slane %v789_v25, 2 }
 0x319   : > { %v791_v22 = vadd.f32 %v790_v31, %v789_v25 }
 0x31b   : > { %v792_v12 = vrot.slane %v791_v22, 1 }
 0x31d   : > { %v793_v49 = vadd.f32 %v792_v12, %v791_v22 }
 0x31f   : > { %v715_v55 = vpop.permute.xlu1 %714 }
 0x320   : > { %v753_v58 = vmul.f32 %v715_v55, %v1439_v7  ;;  %v728_v59 = vpop.permute.xlu2 %727 }
 0x321   : > { %v755_v18 = vmul.f32 %v728_v59, %v1476_v14  ;;  %v798_v14 = vadd.f32 %v797_v3, %v796_v57 }
 0x322   : > { %v804_v63 = vsel %vm349_vm0, %v753_v58, 0.0 }
 0x323   : > { %v805_v1 = vadd.f32 %v804_v63, %v803_v62  ;;  %v813_v2 = vsel %vm349_vm0, %v755_v18, 0.0  ;;  %v799_v33 = vrot.slane %v798_v14, 2  ;;  %v1139_v63 = vld [vmem:[%s1680_s5] ss:$0 sm:$0xff] }
 0x324   : > { %v814_v7 = vadd.f32 %v813_v2, %v812_v0 }
 0x325   : > { %v806_v23 = vrot.slane %v805_v1, 4  ;;  %v800_v41 = vadd.f32 %v799_v33, %v798_v14 }
 0x326   : > { %v815_v26 = vrot.slane %v814_v7, 4 }
 0x327   : > { %v807_v29 = vadd.f32 %v806_v23, %v805_v1  ;;  %v801_v44 = vrot.slane %v800_v41, 1 }
 0x328   : > { %v741_v32 = vpop.permute.xlu2 %740  ;;  %v816_v34 = vadd.f32 %v815_v26, %v814_v7 }
 0x329   : > { %v808_v37 = vrot.slane %v807_v29, 2  ;;  %v757_v39 = vmul.f32 %v741_v32, %v1503_v19  ;;  %v766_v19 = vadd.f32 %v765_v43, %v764_v36 }
 0x32a   : > { %v817_v42 = vrot.slane %v816_v34, 2 }
 0x32b   : > { %v809_v6 = vadd.f32 %v808_v37, %v807_v29  ;;  %v822_v5 = vsel %vm349_vm0, %v757_v39, 0.0  ;;  %v846_v50 = vsel %vm597_vm3, %v775_v8, %v766_v19 }
 0x32c   : > { %v818_v45 = vadd.f32 %v817_v42, %v816_v34  ;;  %v847_v55 = vsel %vm599_vm4, %v784_v48, %v846_v50 }
 0x32d   : > { %v810_v46 = vrot.slane %v809_v6, 1  ;;  %v848_v57 = vsel %vm601_vm5, %v793_v49, %v847_v55 }
 0x32e   : > { %v819_v52 = vrot.slane %v818_v45, 1 }
 0x32f   : > { %v735_v40 = vpop.permute.xlu1 %734  ;;  %v811_v53 = vadd.f32 %v810_v46, %v809_v6 }
 0x330   : > { %v756_v13 = vmul.f32 %v735_v40, %v1491_v17  ;;  %v802_v17 = vadd.f32 %v801_v44, %v800_v41  ;;  %v820_v58 = vadd.f32 %v819_v52, %v818_v45 }
 0x332   : > { %v821_v11 = vsel %vm349_vm0, %v756_v13, 0.0  ;;  %v849_v59 = vsel %vm603_vm6, %v802_v17, %v848_v57 }
 0x333   : > { %v823_v16 = vadd.f32 %v822_v5, %v821_v11  ;;  %v850_v47 = vsel %vm605_vm7, %v811_v53, %v849_v59 }
 0x334   : > { %v851_v61 = vsel %vm607_vm8, %v820_v58, %v850_v47 }
 0x335   : > { %v824_v15 = vrot.slane %v823_v16, 4 }
 0x337   : > { %v825_v51 = vadd.f32 %v824_v15, %v823_v16 }
 0x339   : > { %v826_v54 = vrot.slane %v825_v51, 2 }
 0x33b   : > { %v827_v56 = vadd.f32 %v826_v54, %v825_v51 }
 0x33d   : > { %v828_v60 = vrot.slane %v827_v56, 1 }
 0x33f   : > { %v829_v18 = vadd.f32 %v828_v60, %v827_v56 }
 0x341   : > { %v852_v62 = vsel %vm609_vm9, %v829_v18, %v851_v61 }
 0x342   : > { %1059 = vmatmul.msk.f32.vlgmr.msrb.gmra.mxu1 %vm349_vm0, %v852_v62 }
 0x3bf   : > { %v872_v10 = vpop.f32.mrf.mxu1 }
 0x3c0   : > { %v873_v0 = vadd.f32 %v1139_v63, %v872_v10 }
 0x3c2   : > { %v876_v1 = vsel %vm875_vm1, %v873_v0, -inf }
 0x3c3   : > { %877 = vmax.xlane.f32.xlu1 %v876_v1 }
 0x436   : > { %v878_v2 = vpop.xlane.xlu1 %877 }
 0x437   : > { %v879_v3 = vsub.f32 %v873_v0, %v878_v2 }
 0x439   : > { %v880_v7 = vmul.f32 1.442695, %v879_v3 }
 0x43b   : > { %1176 = vpow2.f32 %v880_v7 }
 0x441   : > { %v1177_v20 = vpop.eup %1176 }
 0x442   : > { %v882_v21 = vsel %vm875_vm1, %v1177_v20, 0.0 }
 0x443   : > { %883 = vadd.xlane.f32.xlu0 %v882_v21 }
 0x444   : > { %1237 = shalt.err (!%p1234_p7)
}
 0x445   : > { %1080 = dma.vmem_to_hbm [thread:$0]  (%p1371_p11), %s923_s12, 128, %s925_s18, %s907_s19  }
 0x446   : > { %s1692_s0 = sshll.u32 %s1548_s20, 3 }
 0x447   : > { %s328_s10 = scalar_lea.vmem %s1681_s6, %s1692_s0 }
 0x4b6   : > { %v884_v23 = vpop.xlane.xlu0 %883 }
 0x4b7   : > { %1178 = vrcp.f32 %v884_v23  ;;  %v896_v26 = vand.u32 2147483648, %v884_v23  ;;  %v894_v28 = vand.u32 2147483647, %v884_v23  ;;  %vm890_vm2 = vweird.f32 %v884_v23 }
 0x4b9   : > { %v897_v30 = vor.u32 1.1754944e-38, %v896_v26  ;;  %vm895_vm4 = vcmp.eq.f32.partialorder %v894_v28, 8.507059e+37 }
 0x4bd   : > { %v1179_v24 = vpop.eup %1178 }
 0x4be   : > { %v886_v25 = vmul.f32 %v1179_v24, %v884_v23  ;;  %vm891_vm0 = vweird.f32 %v1179_v24 }
 0x4bf   : > { %vm892_vm3 = vmor %vm890_vm2, %vm891_vm0 }
 0x4c0   : > { %v887_v14 = vsub.f32 1.0, %v886_v25 }
 0x4c2   : > { %v888_v27 = vmul.f32 %v1179_v24, %v887_v14 }
 0x4c4   : > { %v889_v29 = vadd.f32 %v1179_v24, %v888_v27 }
 0x4c6   : > { %v893_v31 = vsel %vm892_vm3, %v1179_v24, %v889_v29 }
 0x4c7   : > { %v898_v32 = vsel %vm895_vm4, %v897_v30, %v893_v31 }
 0x4c8   : > { %v899_v33 = vmul.f32 %v1177_v20, %v898_v32 }
 0x4ca   : > { %900 = vst.msk [vmem:[%s328_s10] sm:$0xff] %vm875_vm1, %v899_v33 }
 0x4cb PF: > { %s943_s29 = sand.u32 1, %s1264_s24   ;;  %p1693_p11 = scmp.ge.s32.totalorder %s1276_s27, 2 }
 0x4cc   : > { %s944_s23 = scalar_lea.sflag [#allocation4], %s943_s29 }
 0x4cd   : > { %p1087_p5 = pnand %p1693_p11, %p1375_p12 }
 0x4cf   : > { %p1088_p8 = pneg %p1087_p5 }
 0x4d1   : > { %1259 = dma.done.wait (%p1088_p8), %s944_s23, 128  }
 0x4d2   : > { %1261 = vsyncadd (%p1088_p8), %s944_s23, 4294967168  ;;  %s1694_s20 = sld [smem:[#allocation8_spill]]  ;;  %p21_p10 = scmp.ge.s32.totalorder %s1346_s30, 4  }
 0x4d3   : > { %s1695_s24 = smov %s1268_s25  ;;  %s1696_s25 = smov %s1272_s26 }
 0x4d4   : > { %s1698_s27 = smov %s1346_s30  ;;  %23 = sbr.rel (!%p21_p10) target bundleno = 7 (0x7), region = 104 }
 0x4d8   : > { %s1697_s26 = smov %s1694_s20 }
 0x4d9   :  { %950 = vsyncpa [#allocation3], 1 }
 0x4da   :  { %952 = vsyncpa [#allocation3 + $0x1], 1 }
 0x4db   :  { %953 = vsyncpa [#allocation4], 1 }
 0x4dc   :  { %955 = vsyncpa [#allocation4 + $0x1], 1 }

</bundles_post_ra>
